<compile_context>
chip_gen: v7x
topology: tpu7x:2x2x1
jax: 0.10.0
libtpu: 0.0.40
codegen_flags: <defaults>
</compile_context>

<pallas_src>
import functools

import jax
import jax.numpy as jnp
import numpy as np
from jax.experimental import pallas as pl
from jax.experimental.pallas import tpu as pltpu

# Keep f32 matmul precision identical between the Pallas kernels and the
# pure-JAX reference used for the correctness check.
jax.config.update("jax_default_matmul_precision", "highest")


# ----------------------------- Pallas kernels -----------------------------

def patch_embed_kernel(p_ref, w_ref, b_ref, pos_ref, out_ref):
    # Single program: (B*N, K) @ (K, D) + conv bias + positional embedding.
    y = jnp.dot(p_ref[...], w_ref[...], preferred_element_type=jnp.float32)
    out_ref[...] = y + b_ref[...] + pos_ref[...]


def glom_stack_kernel(x0_ref, pos_ref,
                      bu_w1_ref, bu_b1_ref, td_w1_ref, td_b1_ref,
                      w2_ref, b2_ref, ln_g_ref, ln_b_ref,
                      out_ref, *, n_levels, batch, n_tokens):
    """One grid step == one full GlomLayer applied to ALL levels at once.

    out_ref is the resident VMEM carry for the activations (its block index is
    constant across the grid, so it is written back to HBM only once, after
    the last layer).  Row layout: row = l*(B*N) + b*N + n.
    """
    t = pl.program_id(0)

    @pl.when(t == 0)
    def _():
        out_ref[...] = x0_ref[...]

    NL = n_levels
    BN = batch * n_tokens
    R, DL = out_ref.shape                       # R = NL * BN

    x = out_ref[...]                            # (R, DL), level-major rows

    # Level-shifted stacks feeding the bottom-up / top-down MLPs.
    # Row l*BN+k of x_prev holds level l-1 (zeros at l=0); of x_next holds
    # level l+1 (zeros at l=NL-1).  The MLP of a zero input still contributes
    # its bias-driven constant, exactly as in the PyTorch reference.
    zeros_blk = jnp.zeros((BN, DL), jnp.float32)
    x_prev = jnp.concatenate([zeros_blk, x[: (NL - 1) * BN]], axis=0)
    x_next = jnp.concatenate([x[BN:], zeros_blk], axis=0)

    # Bottom-up / top-down MLPs, batched over all NL levels.  The two second
    # projections are fused into a single matmul with w2 = [bu_w2; td_w2] and
    # bias b2 = bu_b2 + td_b2.
    h_bu = jnp.dot(x_prev, bu_w1_ref[0],
                   preferred_element_type=jnp.float32) + bu_b1_ref[0]
    h_td = jnp.dot(x_next, td_w1_ref[0],
                   preferred_element_type=jnp.float32) + td_b1_ref[0]
    h = jnp.concatenate([jax.nn.gelu(h_bu, approximate=True),
                         jax.nn.gelu(h_td, approximate=True)], axis=-1)  # (R, 2H)
    z_mlp = jnp.dot(h, w2_ref[0], preferred_element_type=jnp.float32) + b2_ref[0]

    # attention(x) per (level, batch) group:
    #   att = x @ x^T ; softmax over dim 1 (as torch F.softmax(att, 1)) ; att @ x
    G = NL * batch
    x3 = x.reshape(G, n_tokens, DL)
    att = jnp.einsum('gnd,gmd->gnm', x3, x3, preferred_element_type=jnp.float32)
    att = jnp.exp(att - jnp.max(att, axis=1, keepdims=True))
    denom = jnp.sum(att, axis=1, keepdims=True)
    # approx=True would push this onto the EUP but loosens the f32 check.
    att = att * pl.reciprocal(denom, approx=False)
    z_att = jnp.einsum('gnm,gmd->gnd', att, x3,
                       preferred_element_type=jnp.float32).reshape(R, DL)

    # Combine (+ pos_lev_emb, shared across layers) and LayerNorm over DL.
    z = z_att + z_mlp + pos_ref[...]
    mu = jnp.mean(z, axis=-1, keepdims=True)
    var = jnp.mean((z - mu) ** 2, axis=-1, keepdims=True)
    z = (z - mu) * jax.lax.rsqrt(var + 1e-5)
    out_ref[...] = z * ln_g_ref[0] + ln_b_ref[0]


# ----------------------------- Pallas wrappers -----------------------------

def patch_embed_pallas(patches2d, w, b, pos2d):
    BN, K = patches2d.shape
    D = w.shape[1]
    return pl.pallas_call(
        patch_embed_kernel,
        out_shape=jax.ShapeDtypeStruct((BN, D), jnp.float32),
        grid=(1,),
        in_specs=[
            pl.BlockSpec((BN, K), lambda i: (0, 0)),
            pl.BlockSpec((K, D), lambda i: (0, 0)),
            pl.BlockSpec((1, D), lambda i: (0, 0)),
            pl.BlockSpec((BN, D), lambda i: (0, 0)),
        ],
        out_specs=pl.BlockSpec((BN, D), lambda i: (0, 0)),
    )(patches2d, w, b, pos2d)


def glom_stack_pallas(x0, pos_add, sp, *, n_levels, batch, n_tokens):
    # x0, pos_add: [NL*B*N, DL]; sp: per-layer weights stacked on a leading
    # n_layers axis.
    R, DL = x0.shape
    L, _, H = sp['bu_w1'].shape

    def resident(shape):
        # Block index never changes -> fetched once, resident in VMEM.
        return pl.BlockSpec(shape, lambda t: (0,) * len(shape))

    def per_layer(shape):
        # One layer's weights per grid step (auto double-buffered prefetch).
        return pl.BlockSpec((1,) + shape, lambda t: (t,) + (0,) * len(shape))

    kernel = functools.partial(glom_stack_kernel, n_levels=n_levels,
                               batch=batch, n_tokens=n_tokens)
    return pl.pallas_call(
        kernel,
        out_shape=jax.ShapeDtypeStruct((R, DL), jnp.float32),
        grid=(L,),
        in_specs=[
            resident((R, DL)),            # x0 (only read at layer 0)
            resident((R, DL)),            # pos_lev_emb broadcast to rows
            per_layer((DL, H)),           # bu_w1
            per_layer((1, H)),            # bu_b1
            per_layer((DL, H)),           # td_w1
            per_layer((1, H)),            # td_b1
            per_layer((2 * H, DL)),       # [bu_w2; td_w2]
            per_layer((1, DL)),           # bu_b2 + td_b2
            per_layer((1, DL)),           # LayerNorm gamma
            per_layer((1, DL)),           # LayerNorm beta
        ],
        out_specs=resident((R, DL)),      # resident carry across layers
        compiler_params=pltpu.CompilerParams(
            dimension_semantics=("arbitrary",)),   # layers are sequential
    )(x0, pos_add, sp['bu_w1'], sp['bu_b1'], sp['td_w1'], sp['td_b1'],
      sp['w2_cat'], sp['b2_sum'], sp['ln_g'], sp['ln_b'])


# ----------------------------- glue / params -----------------------------

def im2col(x, P):
    # NCHW -> [B, N, C*P*P] raster-order patches (matches Conv2d stride=kernel=P
    # followed by flatten(2).transpose(1,2)).
    B, C, Himg, Wimg = x.shape
    GH, GW = Himg // P, Wimg // P
    x = x.reshape(B, C, GH, P, GW, P)
    x = jnp.transpose(x, (0, 2, 4, 1, 3, 5))            # B, GH, GW, C, P, P
    return x.reshape(B, GH * GW, C * P * P)


def stack_layer_params(layers):
    st = lambda k: jnp.stack([lp[k] for lp in layers], axis=0)
    return {
        'bu_w1': st('bu_w1'), 'bu_b1': st('bu_b1'),
        'td_w1': st('td_w1'), 'td_b1': st('td_b1'),
        'w2_cat': jnp.stack([jnp.concatenate([lp['bu_w2'], lp['td_w2']], axis=0)
                             for lp in layers], axis=0),            # (L, 2H, DL)
        'b2_sum': jnp.stack([lp['bu_b2'] + lp['td_b2'] for lp in layers], axis=0),
        'ln_g': st('ln_g'), 'ln_b': st('ln_b'),
    }


def init_params(key, *, img_size, patch_size, in_chans, n_layers, n_levels,
                n_embed, mlp_ratio):
    DL = n_embed // n_levels
    H = DL * mlp_ratio
    N = (img_size // patch_size) ** 2
    K = in_chans * patch_size * patch_size
    keys = jax.random.split(key, 4 + n_layers)
    p = {
        'proj_w': jax.random.normal(keys[0], (n_embed, in_chans, patch_size, patch_size),
                                    jnp.float32) / np.sqrt(K),
        'proj_b': jax.random.normal(keys[1], (n_embed,), jnp.float32) * 0.02,
        'pos_emb': jax.random.normal(keys[2], (N, n_embed), jnp.float32),
        'pos_lev_emb': jax.random.normal(keys[3], (n_levels, DL), jnp.float32),
    }
    layers = []
    for i in range(n_layers):
        lk = jax.random.split(keys[4 + i], 8)
        layers.append({
            'bu_w1': jax.random.normal(lk[0], (DL, H), jnp.float32) / np.sqrt(DL),
            'bu_b1': jax.random.normal(lk[1], (1, H), jnp.float32) * 0.02,
            'bu_w2': jax.random.normal(lk[2], (H, DL), jnp.float32) / np.sqrt(H),
            'bu_b2': jax.random.normal(lk[3], (1, DL), jnp.float32) * 0.02,
            'td_w1': jax.random.normal(lk[4], (DL, H), jnp.float32) / np.sqrt(DL),
            'td_b1': jax.random.normal(lk[5], (1, H), jnp.float32) * 0.02,
            'td_w2': jax.random.normal(lk[6], (H, DL), jnp.float32) / np.sqrt(H),
            'td_b2': jax.random.normal(lk[7], (1, DL), jnp.float32) * 0.02,
            'ln_g': jnp.ones((1, DL), jnp.float32),
            'ln_b': jnp.zeros((1, DL), jnp.float32),
        })
    p['layers'] = layers
    return p


def glom_forward_pallas(x_img, params, *, patch_size, n_levels):
    B = x_img.shape[0]
    D = params['proj_w'].shape[0]
    DL = D // n_levels
    patches = im2col(x_img, patch_size)                  # [B, N, K]
    _, N, K = patches.shape
    BN = B * N
    w = params['proj_w'].reshape(D, K).T                 # [K, D]
    b = params['proj_b'].reshape(1, D)
    pos_bn = jnp.tile(params['pos_emb'], (B, 1))         # [B*N, D]
    x = patch_embed_pallas(patches.reshape(BN, K), w, b, pos_bn)   # [B*N, D]

    # Level-major token layout for the fused stack: row = l*B*N + b*N + n.
    x0 = x.reshape(B, N, n_levels, DL).transpose(2, 0, 1, 3).reshape(n_levels * BN, DL)
    pos_add = jnp.repeat(params['pos_lev_emb'], BN, axis=0)        # [NL*B*N, DL]
    sp = stack_layer_params(params['layers'])

    out_flat = glom_stack_pallas(x0, pos_add, sp, n_levels=n_levels,
                                 batch=B, n_tokens=N)              # [NL*B*N, DL]
    return out_flat.reshape(n_levels, B, N, DL).transpose(1, 2, 0, 3)  # [B,N,NL,DL]


# ----------------------------- pure-JAX reference -----------------------------

def _ref_mlp(x, w1, b1, w2, b2):
    h = x @ w1 + b1[0]
    h = jax.nn.gelu(h, approximate=True)
    return h @ w2 + b2[0]


def _ref_glom_layer(x, pos_lev, lp):
    B, N, NL, DL = x.shape
    zs = []
    for l in range(NL):
        xc = x[:, :, l]
        xp = x[:, :, l - 1] if l > 0 else jnp.zeros_like(xc)
        xn = x[:, :, l + 1] if l < NL - 1 else jnp.zeros_like(xc)
        zp = _ref_mlp(xp, lp['bu_w1'], lp['bu_b1'], lp['bu_w2'], lp['bu_b2'])
        zn = _ref_mlp(xn, lp['td_w1'], lp['td_b1'], lp['td_w2'], lp['td_b2'])
        zn = zn + pos_lev[l][None, None]
        att = jnp.einsum('bnd,bmd->bnm', xc, xc)
        att = jax.nn.softmax(att, axis=1)
        za = jnp.einsum('bnm,bmd->bnd', att, xc)
        z = za + zp + zn
        mu = z.mean(-1, keepdims=True)
        var = ((z - mu) ** 2).mean(-1, keepdims=True)
        z = (z - mu) / jnp.sqrt(var + 1e-5) * lp['ln_g'][0] + lp['ln_b'][0]
        zs.append(z)
    return jnp.stack(zs, 2)


def ref_forward(x_img, params, *, patch_size, n_levels):
    B = x_img.shape[0]
    D = params['proj_w'].shape[0]
    DL = D // n_levels
    patches = im2col(x_img, patch_size)
    w = params['proj_w'].reshape(D, -1).T
    x = jnp.einsum('bnk,kd->bnd', patches, w) + params['proj_b'] + params['pos_emb'][None]
    N = x.shape[1]
    x = x.reshape(B, N, n_levels, DL)
    for lp in params['layers']:
        x = _ref_glom_layer(x, params['pos_lev_emb'], lp)
    return x


# ----------------------------- main -----------------------------

if __name__ == "__main__":
    B, C, IMG, P = 2, 3, 16, 4                              # -> N = 16 patches
    n_layers, n_levels, n_embed, mlp_ratio = 2, 4, 32, 4    # -> DL = 8, hidden = 32

    key = jax.random.PRNGKey(0)
    kx, kp = jax.random.split(key)
    x_img = jax.random.normal(kx, (B, C, IMG, IMG), jnp.float32)
    params = init_params(kp, img_size=IMG, patch_size=P, in_chans=C,
                         n_layers=n_layers, n_levels=n_levels,
                         n_embed=n_embed, mlp_ratio=mlp_ratio)

    out = glom_forward_pallas(x_img, params, patch_size=P, n_levels=n_levels)
    out = jax.block_until_ready(out)

    N = (IMG // P) ** 2
    DL = n_embed // n_levels
    assert out.shape == (B, N, n_levels, DL), out.shape

    ref = ref_forward(x_img, params, patch_size=P, n_levels=n_levels)
    np.testing.assert_allclose(np.asarray(out), np.asarray(ref), rtol=1e-3, atol=1e-3)

    print("KERNEL_OK")
</pallas_src>

<mosaic_0001>
module attributes {stable_mosaic.version = 11 : i64} {
  func.func @patch_embed_kernel(%arg0: i32, %arg1: memref<32x48xf32, #tpu.memory_space<vmem>>, %arg2: memref<48x32xf32, #tpu.memory_space<vmem>>, %arg3: memref<1x32xf32, #tpu.memory_space<vmem>>, %arg4: memref<32x32xf32, #tpu.memory_space<vmem>>, %arg5: memref<32x32xf32, #tpu.memory_space<vmem>>) attributes {dimension_semantics = [#tpu.dimension_semantics<arbitrary>], iteration_bounds = array<i64: 1>, scalar_prefetch = 0 : i64, scratch_operands = 0 : i64, tpu.core_type = #tpu.core_type<tc>, window_params = [{pipeline_mode = #tpu.pipeline_mode<synchronous>, transform_indices = @transform_0, window_bounds = array<i64: 32, 48>}, {pipeline_mode = #tpu.pipeline_mode<synchronous>, transform_indices = @transform_1, window_bounds = array<i64: 48, 32>}, {pipeline_mode = #tpu.pipeline_mode<synchronous>, transform_indices = @transform_2, window_bounds = array<i64: 1, 32>}, {pipeline_mode = #tpu.pipeline_mode<synchronous>, transform_indices = @transform_3, window_bounds = array<i64: 32, 32>}, {pipeline_mode = #tpu.pipeline_mode<synchronous>, transform_indices = @transform_4, window_bounds = array<i64: 32, 32>}]} {
    %c0 = arith.constant 0 : index
    %c0_0 = arith.constant 0 : index
    %0 = vector.load %arg1[%c0, %c0_0] : memref<32x48xf32, #tpu.memory_space<vmem>>, vector<32x48xf32>
    %c0_1 = arith.constant 0 : index
    %c0_2 = arith.constant 0 : index
    %1 = vector.load %arg2[%c0_1, %c0_2] : memref<48x32xf32, #tpu.memory_space<vmem>>, vector<48x32xf32>
    %cst = arith.constant dense<0.000000e+00> : vector<32x32xf32>
    %2 = tpu.matmul %0, %1, %cst {dimension_numbers = #tpu.dot_dimension_numbers<[1], [0], [0], [1], [0, 0, 1, 1], [], []>, precision = #tpu.contract_precision<fp32>} : vector<32x48xf32>, vector<48x32xf32>, vector<32x32xf32> -> vector<32x32xf32>
    %c0_3 = arith.constant 0 : index
    %c0_4 = arith.constant 0 : index
    %3 = vector.load %arg3[%c0_3, %c0_4] : memref<1x32xf32, #tpu.memory_space<vmem>>, vector<1x32xf32>
    %4 = vector.broadcast %3 : vector<1x32xf32> to vector<32x32xf32>
    %5 = arith.addf %2, %4 : vector<32x32xf32>
    %c0_5 = arith.constant 0 : index
    %c0_6 = arith.constant 0 : index
    %6 = vector.load %arg4[%c0_5, %c0_6] : memref<32x32xf32, #tpu.memory_space<vmem>>, vector<32x32xf32>
    %7 = arith.addf %5, %6 : vector<32x32xf32>
    %c0_7 = arith.constant 0 : index
    %c0_8 = arith.constant 0 : index
    %8 = vector.load %arg5[%c0_7, %c0_8] : memref<32x32xf32, #tpu.memory_space<vmem>>, vector<32x32xf32>
    tpu.vector_store %arg5[%c0_7, %c0_8], %7 {strides = array<i32>} : memref<32x32xf32, #tpu.memory_space<vmem>>, vector<32x32xf32>,
    return
  }
  func.func @transform_0(%arg0: i32) -> (i32, i32) {
    %c0_i32 = arith.constant 0 : i32
    %c0_i32_0 = arith.constant 0 : i32
    %c0_i32_1 = arith.constant 0 : i32
    return %c0_i32, %c0_i32_0 : i32, i32
  }
  func.func @transform_1(%arg0: i32) -> (i32, i32) {
    %c0_i32 = arith.constant 0 : i32
    %c0_i32_0 = arith.constant 0 : i32
    %c0_i32_1 = arith.constant 0 : i32
    return %c0_i32, %c0_i32_0 : i32, i32
  }
  func.func @transform_2(%arg0: i32) -> (i32, i32) {
    %c0_i32 = arith.constant 0 : i32
    %c0_i32_0 = arith.constant 0 : i32
    %c0_i32_1 = arith.constant 0 : i32
    return %c0_i32, %c0_i32_0 : i32, i32
  }
  func.func @transform_3(%arg0: i32) -> (i32, i32) {
    %c0_i32 = arith.constant 0 : i32
    %c0_i32_0 = arith.constant 0 : i32
    %c0_i32_1 = arith.constant 0 : i32
    return %c0_i32, %c0_i32_0 : i32, i32
  }
  func.func @transform_4(%arg0: i32) -> (i32, i32) {
    %c0_i32 = arith.constant 0 : i32
    %c0_i32_0 = arith.constant 0 : i32
    %c0_i32_1 = arith.constant 0 : i32
    return %c0_i32, %c0_i32_0 : i32, i32
  }
}

</mosaic_0001>

<bundles_post_ra>
// kernel: tpu_custom_call.1
= control target key start
LH: loop header
LB: loop body
LE: loop exit
PB: predicated region body
PF: predicated region fallthrough
CT: control target
= control target key end

     0   :  { %vm35_vm0 = vcmask 392192   ;;  %s1184_s0 = inlined_call_operand.vmem [shape: f32[32,48], index: 0, kind: input, shape index: {}]   ;;  %s1185_s1 = inlined_call_operand.vmem [shape: f32[48,32], index: 1, kind: input, shape index: {}]   ;;  %s1186_s2 = inlined_call_operand.vmem [shape: f32[1,32], index: 2, kind: input, shape index: {}]   ;;  %s1187_s3 = inlined_call_operand.vmem [shape: f32[32,32], index: 3, kind: input, shape index: {}]   ;;  %s1188_s4 = inlined_call_operand.hbm [shape: f32[32,32], index: 4, kind: output, shape index: {}]  }
   0x1   :  { %v22_v0 = vld [vmem:[%s1185_s1] sm:$0xff]  ;;  %v23_v1 = vld [vmem:[%s1185_s1 + $0x8] sm:$0xff]  ;;  %v24_v2 = vld [vmem:[%s1185_s1 + $0x10] sm:$0xff] }
   0x2   :  { %v49_v3 = vand.u32 4294901760, %v22_v0  ;;  %v52_v4 = vand.u32 4294901760, %v23_v1  ;;  %v25_v5 = vld [vmem:[%s1185_s1 + $0x18] sm:$0xff]  ;;  %v55_v6 = vand.u32 4294901760, %v24_v2  ;;  %v26_v7 = vld [vmem:[%s1185_s1 + $0x20] sm:$0xff]  ;;  %v27_v8 = vld [vmem:[%s1185_s1 + $0x28] sm:$0xff] }
   0x3   :  { %v58_v9 = vand.u32 4294901760, %v25_v5  ;;  %v61_v10 = vand.u32 4294901760, %v26_v7  ;;  %v64_v11 = vand.u32 4294901760, %v27_v8  ;;  %v18_v12 = vld [vmem:[%s1184_s0] sm:$0xff]  ;;  %v19_v13 = vld [vmem:[%s1184_s0 + $0x8] sm:$0xff]  ;;  %v20_v18 = vld [vmem:[%s1184_s0 + $0x10] sm:$0xff] }
   0x4   :  { %v1061_v14 = vpack.c.bf16 %v52_v4, %v49_v3  ;;  %v37_v15 = vsel %vm35_vm0, %v18_v12, 0  ;;  %v1064_v16 = vsub.f32 %v22_v0, %v49_v3  ;;  %v1066_v17 = vsub.f32 %v23_v1, %v52_v4 }
   0x5   :  { %9 = vsyncpa [#allocation3], 0  ;;  %v1071_v19 = vpack.c.bf16 %v58_v9, %v55_v6  ;;  %v1073_v20 = vand.u32 4294901760, %v37_v15  ;;  %v40_v21 = vsel %vm35_vm0, %v19_v13, 0  ;;  %v1082_v25 = vsub.f32 %v24_v2, %v55_v6  ;;  %v21_v46 = vld [vmem:[%s1184_s0 + $0x18] sm:$0xff]  ;;  %s1009_s14 = smov [#allocation2]  }
   0x6   :  { %887 = vmatprep.subr.bf16.mxu1 %v1061_v14  ;;  %923 = vmatprep.subr.bf16.mxu0 %v1061_v14  ;;  %v162_v22 = vand.u32 4294901760, %v1064_v16  ;;  %v169_v23 = vand.u32 4294901760, %v1066_v17  ;;  %v1080_v24 = vand.u32 4294901760, %v40_v21  ;;  %v1089_v27 = vsub.f32 %v25_v5, %v58_v9  ;;  %v717_v12 = vld [vmem:[%s1186_s2] ss:$0 sm:$0xff]  ;;  %s706_s15 = sshll.u32 %s1009_s14, 4  ;;  %s707_s15 = int_to_ptr.vmem [resolvable:$true] %s706_s15 }
   0x7   :  { %889 = vmatpush3.bf16.msra.mxu1 %v1061_v14  ;;  %925 = vmatpush3.bf16.msra.mxu0 %v1061_v14  ;;  %v1087_v26 = vsub.f32 %v37_v15, %v1073_v20  ;;  %v43_v28 = vsel %vm35_vm0, %v20_v18, 0  ;;  %v1092_v29 = vsub.f32 %v26_v7, %v61_v10  ;;  %v1096_v30 = vpack.c.bf16 %v64_v11, %v61_v10  ;;  %v689_v18 = vld [vmem:[%s1187_s3 + $0x8] sm:$0xff]  ;;  %s985_s18 = scalar_lea.vmem %s707_s15, 512  ;;  %p990_p1 = scmp.lt.s32.totalorder %s707_s15, %s707_s15 }
   0x8   :  { %891 = vmatprep.subr.bf16.mxu1 %v1071_v19  ;;  %927 = vmatprep.subr.bf16.mxu0 %v1071_v19  ;;  %v163_v31 = vsub.f32 %v1064_v16, %v162_v22  ;;  %v170_v32 = vsub.f32 %v1066_v17, %v169_v23  ;;  %v176_v33 = vand.u32 4294901760, %v1082_v25  ;;  %v1103_v35 = vsub.f32 %v40_v21, %v1080_v24  ;;  %v688_v21 = vld [vmem:[%s1187_s3] sm:$0xff]  ;;  %p986_p0 = scmp.ne.s32.totalorder %s707_s15, %s985_s18  ;;  %p991_p2 = scmp.lt.s32.totalorder %s985_s18, %s985_s18 }
   0x9   :  { %v121_v34 = vand.u32 4294901760, %v1087_v26  ;;  %v183_v36 = vand.u32 4294901760, %v1089_v27  ;;  %v1106_v37 = vand.u32 4294901760, %v43_v28  ;;  %v190_v41 = vand.u32 4294901760, %v1092_v29 }
   0xa   :  { %v164_v38 = vand.u32 4294901760, %v163_v31  ;;  %v171_v39 = vand.u32 4294901760, %v170_v32  ;;  %v177_v40 = vsub.f32 %v1082_v25, %v176_v33  ;;  %v934_v43 = vpack.c.bf16 %v169_v23, %v162_v22  ;;  %p992_p3 = por %p991_p2, %p990_p1 }
   0xb   :  { %893 = vmatpush3.bf16.msra.mxu1 %v1071_v19  ;;  %929 = vmatpush3.bf16.msra.mxu0 %v1071_v19  ;;  %v122_v42 = vsub.f32 %v1087_v26, %v121_v34  ;;  %v131_v44 = vand.u32 4294901760, %v1103_v35  ;;  %v184_v45 = vsub.f32 %v1089_v27, %v183_v36  ;;  %v1121_v49 = vsub.f32 %v43_v28, %v1106_v37 }
   0xc   :  { %895 = vmatprep.subr.bf16.mxu1 %v1096_v30  ;;  %931 = vmatprep.subr.bf16.mxu0 %v1096_v30  ;;  %v898_v47 = vpack.c.bf16 %v171_v39, %v164_v38  ;;  %v178_v48 = vand.u32 4294901760, %v177_v40  ;;  %v191_v50 = vsub.f32 %v1092_v29, %v190_v41  ;;  %v196_v54 = vsub.f32 %v27_v8, %v64_v11  ;;  %p993_p4 = pnand %p992_p3, %p986_p0 }
   0xd   :  { %v123_v51 = vand.u32 4294901760, %v122_v42  ;;  %844 = vmatprep.mubr.f32.mxu0 %v121_v34  ;;  %v132_v52 = vsub.f32 %v1103_v35, %v131_v44  ;;  %v185_v53 = vand.u32 4294901760, %v184_v45  ;;  %v141_v55 = vand.u32 4294901760, %v1121_v49 }
   0xe   :  { %v46_v56 = vsel %vm35_vm0, %v21_v46, 0  ;;  %v197_v58 = vand.u32 4294901760, %v196_v54  ;;  %v938_v61 = vpack.c.bf16 %v183_v36, %v176_v33  ;;  %v192_v63 = vand.u32 4294901760, %v191_v50  ;;  %v690_v33 = vld [vmem:[%s1187_s3 + $0x10] sm:$0xff] }
   0xf   :  { %897 = vmatpush3.bf16.msra.mxu1 %v1096_v30  ;;  %933 = vmatpush3.bf16.msra.mxu0 %v1096_v30  ;;  %v133_v57 = vand.u32 4294901760, %v132_v52  ;;  %v149_v59 = vand.u32 4294901760, %v46_v56  ;;  %v902_v60 = vpack.c.bf16 %v185_v53, %v178_v48  ;;  %v142_v62 = vsub.f32 %v1121_v49, %v141_v55 }
  0x10   :  { %790 = vmatprep.mubr.f32.mxu1 %v123_v51  ;;  %899 = vmatprep.subr.bf16.mxu1 %v898_v47  ;;  %v198_v0 = vsub.f32 %v196_v54, %v197_v58  ;;  %v942_v5 = vpack.c.bf16 %v197_v58, %v190_v41  ;;  %v910_v9 = vpack.c.bf16 %v1066_v17, %v1064_v16  ;;  %vm696_vm1 = vcmask 261120  }
  0x11   :  { %935 = vmatprep.subr.bf16.mxu0 %v934_v43  ;;  %v150_v1 = vsub.f32 %v46_v56, %v149_v59  ;;  %v143_v2 = vand.u32 4294901760, %v142_v62  ;;  %v914_v10 = vpack.c.bf16 %v1089_v27, %v1082_v25  ;;  %v918_v11 = vpack.c.bf16 %v196_v54, %v1092_v29 }
  0x12   :  { %791 = vmatmul.mubr.f32.vlgmr.msra.gmra.mrb[0].mxu1 %v133_v57  ;;  %845 = vmatmul.mubr.f32.vlgmr.msra.gmra.mrb[0].mxu0 %v131_v44  ;;  %v199_v3 = vand.u32 4294901760, %v198_v0 }
  0x13   :  { %901 = vmatpush3.bf16.msra.mxu1 %v898_v47  ;;  %937 = vmatpush3.bf16.msra.mxu0 %v934_v43  ;;  %v151_v4 = vand.u32 4294901760, %v150_v1 }
  0x14   :  { %903 = vmatprep.subr.bf16.mxu1 %v902_v60  ;;  %939 = vmatprep.subr.bf16.mxu0 %v938_v61  ;;  %v906_v6 = vpack.c.bf16 %v199_v3, %v192_v63 }
  0x15   :  { %793 = vmatprep.mubr.f32.mxu1 %v143_v2  ;;  %847 = vmatprep.mubr.f32.mxu0 %v141_v55  ;;  %v152_v7 = vsub.f32 %v150_v1, %v151_v4 }
  0x16   :  { %848 = vmatmul.mubr.f32.gmra.mrb[2].mxu0 %v151_v4 }
  0x17   :  { %905 = vmatpush3.bf16.msra.mxu1 %v902_v60  ;;  %941 = vmatpush3.bf16.msra.mxu0 %v938_v61  ;;  %v153_v8 = vand.u32 4294901760, %v152_v7 }
  0x18   :  { %907 = vmatprep.subr.bf16.mxu1 %v906_v6  ;;  %943 = vmatprep.subr.bf16.mxu0 %v942_v5 }
  0x19   :  { %794 = vmatmul.mubr.f32.gmra.mrb[2].mxu1 %v153_v8  ;;  %862 = vmatprep.mubr.f32.mxu0 %v1073_v20 }
  0x1a   :  { %808 = vmatprep.mubr.f32.mxu1 %v1073_v20 }
  0x1b   :  { %909 = vmatpush3.bf16.msra.mxu1 %v906_v6  ;;  %945 = vmatpush3.bf16.msra.mxu0 %v942_v5 }
  0x1c   :  { %911 = vmatprep.subr.bf16.mxu1 %v910_v9  ;;  %947 = vmatprep.subr.bf16.mxu0 %v1061_v14 }
  0x1e   :  { %809 = vmatmul.mubr.f32.vlgmr.msra.gmra.mrb[0].mxu1 %v1080_v24  ;;  %863 = vmatmul.mubr.f32.vlgmr.msra.gmra.mrb[0].mxu0 %v1080_v24 }
  0x1f   :  { %913 = vmatpush3.bf16.msra.mxu1 %v910_v9  ;;  %949 = vmatpush3.bf16.msra.mxu0 %v1061_v14 }
  0x20   :  { %915 = vmatprep.subr.bf16.mxu1 %v914_v10  ;;  %951 = vmatprep.subr.bf16.mxu0 %v1071_v19 }
  0x21   :  { %811 = vmatprep.mubr.f32.mxu1 %v1106_v37  ;;  %865 = vmatprep.mubr.f32.mxu0 %v1106_v37 }
  0x22   :  { %812 = vmatmul.mubr.f32.gmra.mrb[2].mxu1 %v149_v59  ;;  %866 = vmatmul.mubr.f32.gmra.mrb[2].mxu0 %v149_v59 }
  0x23   :  { %917 = vmatpush3.bf16.msra.mxu1 %v914_v10  ;;  %953 = vmatpush3.bf16.msra.mxu0 %v1071_v19 }
  0x24   :  { %919 = vmatprep.subr.bf16.mxu1 %v918_v11  ;;  %955 = vmatprep.subr.bf16.mxu0 %v1096_v30 }
  0x25   :  { %826 = vmatprep.mubr.f32.mxu1 %v1087_v26  ;;  %880 = vmatprep.mubr.f32.mxu0 %v1073_v20 }
  0x27   :  { %921 = vmatpush3.bf16.msra.mxu1 %v918_v11  ;;  %957 = vmatpush3.bf16.msra.mxu0 %v1096_v30  ;;  %v691_v30 = vld [vmem:[%s1187_s3 + $0x18] sm:$0xff] }
  0x2a   :  { %827 = vmatmul.mubr.f32.vlgmr.msra.gmra.mrb[0].mxu1 %v1103_v35  ;;  %881 = vmatmul.mubr.f32.vlgmr.msra.gmra.mrb[0].mxu0 %v1080_v24 }
  0x2b   :  { %829 = vmatprep.mubr.f32.mxu1 %v1121_v49  ;;  %883 = vmatprep.mubr.f32.mxu0 %v1106_v37 }
  0x2e   :  { %830 = vmatmul.mubr.f32.gmra.mrb[2].mxu1 %v150_v1  ;;  %884 = vmatmul.mubr.f32.gmra.mrb[2].mxu0 %v149_v59 }
  0xfd   :  { %v828_v13 = vpop.f32.mrb[0].mxu1  ;;  %v882_v14 = vpop.f32.mrb[0].mxu0 }
  0xfe   :  { %v958_v15 = vadd.f32 %v828_v13, %v717_v12  ;;  %v358_v16 = vpop.f32.mrb[1].mxu1  ;;  %v666_v17 = vpop.f32.mrb[1].mxu0 }
  0xff   :  { %v960_v19 = vadd.f32 %v717_v12, %v358_v16 }
 0x100   :  { %v959_v20 = vadd.f32 %v958_v15, %v882_v14 }
 0x101   :  { %v961_v22 = vadd.f32 %v960_v19, %v666_v17  ;;  %v831_v23 = vpop.f32.mrb[2].mxu1  ;;  %v885_v24 = vpop.f32.mrb[2].mxu0 }
 0x102   :  { %v693_v25 = vadd.f32 %v959_v20, %v689_v18  ;;  %v962_v26 = vadd.f32 %v831_v23, %v717_v12  ;;  %v372_v27 = vpop.f32.mrb[3].mxu1  ;;  %v678_v28 = vpop.f32.mrb[3].mxu0 }
 0x103   :  { %v692_v29 = vadd.f32 %v961_v22, %v688_v21  ;;  %v964_v31 = vadd.f32 %v717_v12, %v372_v27 }
 0x104   :  { %698 = vst.msk [vmem:[#allocation2 + $0x8] sm:$0xff] %vm696_vm1, %v693_v25  ;;  %v963_v32 = vadd.f32 %v962_v26, %v885_v24 }
 0x105   :  { %697 = vst.msk [vmem:[#allocation2] sm:$0xff] %vm696_vm1, %v692_v29  ;;  %v965_v34 = vadd.f32 %v964_v31, %v678_v28 }
 0x106   :  { %v695_v35 = vadd.f32 %v963_v32, %v691_v30 }
 0x107   :  { %v694_v36 = vadd.f32 %v965_v34, %v690_v33 }
 0x108   :  { %700 = vst.msk [vmem:[#allocation2 + $0x18] sm:$0xff] %vm696_vm1, %v695_v35 }
 0x109   :  { %699 = vst.msk [vmem:[#allocation2 + $0x10] sm:$0xff] %vm696_vm1, %v694_v36 }
 0x10a   :  { %996 = shalt.err (!%p993_p4)
}
 0x10b   :  { %s997_s3 = scalar_lea.hbm %s1188_s4, 512 }
 0x10c   :  { %p998_p5 = scmp.ne.s32.totalorder %s1188_s4, %s997_s3  ;;  %p1001_p6 = scmp.lt.u32.totalorder %s997_s3, %s1188_s4 }
 0x10e   :  { %p1003_p7 = pnand %p1001_p6, %p998_p5 }
 0x110   :  { %1006 = shalt.err (!%p1003_p7)
}
 0x111   :  { %s1010_s25 = smov 128   ;;  %s1011_s26 = smov 8  }
 0x112   :  { %712 = dma.vmem_to_hbm [thread:$0]  %s707_s15, 512, %s1188_s4, [#allocation3], %s1010_s25, %s1010_s25, %s1011_s26  }
 0x113   :  { %1007 = dma.done.wait [#allocation3], 512  }
 0x114   :  { %1008 = vsyncadd [#allocation3], 4294966784 }
 0x115   :  { %716 = vsyncpa [#allocation3], 1 }

</bundles_post_ra>
